<compile_context>
chip_gen: v7x
topology: tpu7x:2x2x1
jax: 0.10.0
libtpu: 0.0.40
codegen_flags: <defaults>
</compile_context>

<pallas_src>
import jax
import jax.numpy as jnp
from jax.experimental import pallas as pl
from jax.experimental.pallas import tpu as pltpu

EPS = 1e-6


def sublayer_connection_kernel(x_ref, a_ref, b_ref, w_ref, wb_ref, o_ref):
    # x_ref: (TM, D) tile of input rows. All norm math in f32.
    x = x_ref[...].astype(jnp.float32)
    d = x.shape[-1]

    # --- LayerNorm (torch semantics: mean / unbiased std / (std + eps)) ---
    mean = jnp.mean(x, axis=-1, keepdims=True)
    xc = x - mean
    var_unbiased = jnp.sum(xc * xc, axis=-1, keepdims=True) / (d - 1)
    std = jnp.sqrt(var_unbiased)
    inv = pl.reciprocal(std + EPS, approx=False)       # EUP, exact
    a = a_ref[...].astype(jnp.float32)
    b = b_ref[...].astype(jnp.float32)
    normed = a * xc * inv + b

    # --- sublayer: Linear(D, D) on the MXU, f32 accumulation ---
    y = jnp.dot(normed.astype(w_ref.dtype), w_ref[...],
                preferred_element_type=jnp.float32)
    y = y + wb_ref[...].astype(jnp.float32)

    # --- dropout (eval mode -> identity) + residual add ---
    o_ref[...] = (x + y).astype(o_ref.dtype)


def _round_up(x, m):
    return pl.cdiv(x, m) * m


def sublayer_connection(x, a_2, b_2, w, wb, *, tm=None):
    """x: (B, S, D). Returns x + Linear(LayerNorm(x)) (dropout in eval mode)."""
    B, S, D = x.shape
    M = B * S

    # Sublane packing: 8 rows/vreg for 32-bit, 16 for bf16.
    row_align = 16 if x.dtype == jnp.bfloat16 else 8
    if tm is None:
        # HBM-bound at D=128: target >= ~1 MiB blocks per stream.
        tm = 4096 if x.dtype == jnp.bfloat16 else 2048

    # Balance tiles and keep >= 2 grid steps for non-tiny problems so the
    # "parallel" axis shards across both v7x TensorCores.
    steps = max(2, pl.cdiv(M, tm)) if M >= 1024 else 1
    tm_eff = _round_up(pl.cdiv(M, steps), row_align)
    grid = pl.cdiv(M, tm_eff)

    # No padding / slicing: Pallas masks the partial boundary block. All math
    # in the kernel is row-local, so garbage rows in the boundary block are
    # harmless and their out-of-bounds writes are dropped.
    x2 = x.reshape(M, D)
    a2 = a_2.reshape(1, D)
    b2 = b_2.reshape(1, D)
    w2 = w.astype(x.dtype)
    wb2 = wb.reshape(1, D).astype(x.dtype)

    itemsize = jnp.dtype(x.dtype).itemsize
    cost = pl.CostEstimate(
        flops=2 * M * D * D + 10 * M * D,
        transcendentals=2 * M,
        bytes_accessed=2 * M * D * itemsize + D * D * itemsize + 3 * D * 4,
    )

    out = pl.pallas_call(
        sublayer_connection_kernel,
        out_shape=jax.ShapeDtypeStruct((M, D), x.dtype),
        grid_spec=pltpu.PrefetchScalarGridSpec(
            num_scalar_prefetch=0,
            grid=(grid,),
            in_specs=[
                pl.BlockSpec((tm_eff, D), lambda i: (i, 0)),   # x rows
                pl.BlockSpec((1, D), lambda i: (0, 0)),        # a_2 (gain)
                pl.BlockSpec((1, D), lambda i: (0, 0)),        # b_2 (bias)
                pl.BlockSpec((D, D), lambda i: (0, 0)),        # sublayer weight
                pl.BlockSpec((1, D), lambda i: (0, 0)),        # sublayer bias
            ],
            out_specs=pl.BlockSpec((tm_eff, D), lambda i: (i, 0)),
        ),
        compiler_params=pltpu.CompilerParams(
            dimension_semantics=("parallel",),
        ),
        cost_estimate=cost,
    )(x2, a2, b2, w2, wb2)

    return out.reshape(B, S, D)


def reference(x, a_2, b_2, w, wb):
    xf = x.astype(jnp.float32)
    mean = jnp.mean(xf, axis=-1, keepdims=True)
    xc = xf - mean
    d = xf.shape[-1]
    std = jnp.sqrt(jnp.sum(xc * xc, axis=-1, keepdims=True) / (d - 1))
    normed = a_2 * xc / (std + EPS) + b_2
    y = normed @ w + wb
    return (xf + y).astype(x.dtype)


if __name__ == "__main__":
    key = jax.random.PRNGKey(0)
    D = 128  # hidden ("size")

    kx, kw, kb, kx2 = jax.random.split(key, 4)

    # LayerNorm params (as in __init__: ones / zeros)
    a_2 = jnp.ones((D,), dtype=jnp.float32)
    b_2 = jnp.zeros((D,), dtype=jnp.float32)

    # Deterministic sublayer (Linear D->D) params
    w = jax.random.normal(kw, (D, D), dtype=jnp.float32) * 0.02
    wb = jax.random.normal(kb, (D,), dtype=jnp.float32) * 0.02

    # Case 1: small, tile-aligned shape.
    B, S = 2, 8
    x = jax.random.normal(kx, (B, S, D), dtype=jnp.float32)
    out = jax.block_until_ready(sublayer_connection(x, a_2, b_2, w, wb))
    ref = reference(x, a_2, b_2, w, wb)
    assert out.shape == (B, S, D)
    assert jnp.allclose(out, ref, atol=1e-4, rtol=1e-4), float(
        jnp.max(jnp.abs(out - ref))
    )

    # Case 2: ragged row count (M not a multiple of the tile / sublane pack)
    # exercises the masked boundary-block path (no jnp.pad, no output slice).
    B2, S2 = 3, 5
    x2 = jax.random.normal(kx2, (B2, S2, D), dtype=jnp.float32)
    out2 = jax.block_until_ready(sublayer_connection(x2, a_2, b_2, w, wb))
    ref2 = reference(x2, a_2, b_2, w, wb)
    assert out2.shape == (B2, S2, D)
    assert jnp.allclose(out2, ref2, atol=1e-4, rtol=1e-4), float(
        jnp.max(jnp.abs(out2 - ref2))
    )

    print("KERNEL_OK")
</pallas_src>

<mosaic_0001>
module attributes {stable_mosaic.version = 11 : i64} {
  func.func @sublayer_connection_kernel(%arg0: i32, %arg1: memref<16x128xf32, #tpu.memory_space<vmem>>, %arg2: memref<1x128xf32, #tpu.memory_space<vmem>>, %arg3: memref<1x128xf32, #tpu.memory_space<vmem>>, %arg4: memref<128x128xf32, #tpu.memory_space<vmem>>, %arg5: memref<1x128xf32, #tpu.memory_space<vmem>>, %arg6: memref<16x128xf32, #tpu.memory_space<vmem>>) attributes {dimension_semantics = [#tpu.dimension_semantics<parallel>], iteration_bounds = array<i64: 1>, scalar_prefetch = 0 : i64, scratch_operands = 0 : i64, tpu.core_type = #tpu.core_type<tc>, window_params = [{transform_indices = @transform_0, window_bounds = array<i64: 16, 128>}, {pipeline_mode = #tpu.pipeline_mode<synchronous>, transform_indices = @transform_1, window_bounds = array<i64: 1, 128>}, {pipeline_mode = #tpu.pipeline_mode<synchronous>, transform_indices = @transform_2, window_bounds = array<i64: 1, 128>}, {pipeline_mode = #tpu.pipeline_mode<synchronous>, transform_indices = @transform_3, window_bounds = array<i64: 128, 128>}, {pipeline_mode = #tpu.pipeline_mode<synchronous>, transform_indices = @transform_4, window_bounds = array<i64: 1, 128>}, {transform_indices = @transform_5, window_bounds = array<i64: 16, 128>}]} {
    %c0 = arith.constant 0 : index
    %c0_0 = arith.constant 0 : index
    %0 = vector.load %arg1[%c0, %c0_0] : memref<16x128xf32, #tpu.memory_space<vmem>>, vector<16x128xf32>
    %cst = arith.constant dense<0.000000e+00> : vector<16xf32>
    %1 = vector.multi_reduction <add>, %0, %cst [1] : vector<16x128xf32> to vector<16xf32>
    %2 = vector.shape_cast %1 : vector<16xf32> to vector<16x1xf32>
    %cst_1 = arith.constant 1.280000e+02 : f32
    %3 = vector.broadcast %cst_1 : f32 to vector<16x1xf32>
    %4 = arith.divf %2, %3 : vector<16x1xf32>
    %5 = vector.broadcast %4 : vector<16x1xf32> to vector<16x128xf32>
    %6 = arith.subf %0, %5 : vector<16x128xf32>
    %7 = arith.mulf %6, %6 : vector<16x128xf32>
    %cst_2 = arith.constant dense<0.000000e+00> : vector<16xf32>
    %8 = vector.multi_reduction <add>, %7, %cst_2 [1] : vector<16x128xf32> to vector<16xf32>
    %9 = vector.shape_cast %8 : vector<16xf32> to vector<16x1xf32>
    %cst_3 = arith.constant 1.270000e+02 : f32
    %10 = vector.broadcast %cst_3 : f32 to vector<16x1xf32>
    %11 = arith.divf %9, %10 : vector<16x1xf32>
    %12 = math.sqrt %11 : vector<16x1xf32>
    %cst_4 = arith.constant 9.99999997E-7 : f32
    %13 = vector.broadcast %cst_4 : f32 to vector<16x1xf32>
    %14 = arith.addf %12, %13 : vector<16x1xf32>
    %15 = tpu.reciprocal %14 : vector<16x1xf32> -> vector<16x1xf32>
    %c0_5 = arith.constant 0 : index
    %c0_6 = arith.constant 0 : index
    %16 = vector.load %arg2[%c0_5, %c0_6] : memref<1x128xf32, #tpu.memory_space<vmem>>, vector<1x128xf32>
    %c0_7 = arith.constant 0 : index
    %c0_8 = arith.constant 0 : index
    %17 = vector.load %arg3[%c0_7, %c0_8] : memref<1x128xf32, #tpu.memory_space<vmem>>, vector<1x128xf32>
    %18 = vector.broadcast %16 : vector<1x128xf32> to vector<16x128xf32>
    %19 = arith.mulf %18, %6 : vector<16x128xf32>
    %20 = vector.broadcast %15 : vector<16x1xf32> to vector<16x128xf32>
    %21 = arith.mulf %19, %20 : vector<16x128xf32>
    %22 = vector.broadcast %17 : vector<1x128xf32> to vector<16x128xf32>
    %23 = arith.addf %21, %22 : vector<16x128xf32>
    %c0_9 = arith.constant 0 : index
    %c0_10 = arith.constant 0 : index
    %24 = vector.load %arg4[%c0_9, %c0_10] : memref<128x128xf32, #tpu.memory_space<vmem>>, vector<128x128xf32>
    %cst_11 = arith.constant dense<0.000000e+00> : vector<16x128xf32>
    %25 = tpu.matmul %23, %24, %cst_11 {dimension_numbers = #tpu.dot_dimension_numbers<[1], [0], [0], [1], [0, 0, 1, 1], [], []>} : vector<16x128xf32>, vector<128x128xf32>, vector<16x128xf32> -> vector<16x128xf32>
    %c0_12 = arith.constant 0 : index
    %c0_13 = arith.constant 0 : index
    %26 = vector.load %arg5[%c0_12, %c0_13] : memref<1x128xf32, #tpu.memory_space<vmem>>, vector<1x128xf32>
    %27 = vector.broadcast %26 : vector<1x128xf32> to vector<16x128xf32>
    %28 = arith.addf %25, %27 : vector<16x128xf32>
    %29 = arith.addf %0, %28 : vector<16x128xf32>
    %c0_14 = arith.constant 0 : index
    %c0_15 = arith.constant 0 : index
    %30 = vector.load %arg6[%c0_14, %c0_15] : memref<16x128xf32, #tpu.memory_space<vmem>>, vector<16x128xf32>
    tpu.vector_store %arg6[%c0_14, %c0_15], %29 {strides = array<i32>} : memref<16x128xf32, #tpu.memory_space<vmem>>, vector<16x128xf32>,
    return
  }
  func.func @transform_0(%arg0: i32) -> (i32, i32) {
    %c0_i32 = arith.constant 0 : i32
    %c0_i32_0 = arith.constant 0 : i32
    return %arg0, %c0_i32 : i32, i32
  }
  func.func @transform_1(%arg0: i32) -> (i32, i32) {
    %c0_i32 = arith.constant 0 : i32
    %c0_i32_0 = arith.constant 0 : i32
    %c0_i32_1 = arith.constant 0 : i32
    return %c0_i32, %c0_i32_0 : i32, i32
  }
  func.func @transform_2(%arg0: i32) -> (i32, i32) {
    %c0_i32 = arith.constant 0 : i32
    %c0_i32_0 = arith.constant 0 : i32
    %c0_i32_1 = arith.constant 0 : i32
    return %c0_i32, %c0_i32_0 : i32, i32
  }
  func.func @transform_3(%arg0: i32) -> (i32, i32) {
    %c0_i32 = arith.constant 0 : i32
    %c0_i32_0 = arith.constant 0 : i32
    %c0_i32_1 = arith.constant 0 : i32
    return %c0_i32, %c0_i32_0 : i32, i32
  }
  func.func @transform_4(%arg0: i32) -> (i32, i32) {
    %c0_i32 = arith.constant 0 : i32
    %c0_i32_0 = arith.constant 0 : i32
    %c0_i32_1 = arith.constant 0 : i32
    return %c0_i32, %c0_i32_0 : i32, i32
  }
  func.func @transform_5(%arg0: i32) -> (i32, i32) {
    %c0_i32 = arith.constant 0 : i32
    %c0_i32_0 = arith.constant 0 : i32
    return %arg0, %c0_i32 : i32, i32
  }
}

</mosaic_0001>

<bundles_post_ra>
// kernel: tpu_custom_call.1
= control target key start
LH: loop header
LB: loop body
LE: loop exit
PB: predicated region body
PF: predicated region fallthrough
CT: control target
= control target key end

     0   :  { %10 = vsyncpa [#allocation3], 0  ;;  %s509_s0 = inlined_call_operand.hbm [shape: f32[16,128], index: 0, kind: input, shape index: {}]   ;;  %s510_s1 = inlined_call_operand.vmem [shape: f32[1,128], index: 1, kind: input, shape index: {}]   ;;  %s511_s2 = inlined_call_operand.vmem [shape: f32[1,128], index: 2, kind: input, shape index: {}]   ;;  %s512_s3 = inlined_call_operand.hbm [shape: f32[128,128], index: 3, kind: input, shape index: {}]   ;;  %s513_s4 = inlined_call_operand.vmem [shape: f32[1,128], index: 4, kind: input, shape index: {}]   ;;  %s514_s5 = inlined_call_operand.hbm [shape: f32[16,128], index: 5, kind: output, shape index: {}]  }
   0x1   :  { %11 = vsyncpa [#allocation6], 0 }
   0x2   :  { %12 = vsyncpa [#allocation4], 0  ;;  %s400_s18 = smov [#allocation2]   ;;  %s328_s22 = scalar_lea.hbm %s509_s0, 256 }
   0x3   :  { %s18_s19 = sshll.u32 %s400_s18, 4  ;;  %p329_p0 = scmp.ne.s32.totalorder %s509_s0, %s328_s22  ;;  %s19_s19 = int_to_ptr.vmem [resolvable:$true] %s18_s19 }
   0x4   :  { %p332_p1 = scmp.lt.u32.totalorder %s328_s22, %s509_s0 }
   0x6   :  { %p334_p2 = pnand %p332_p1, %p329_p0 }
   0x8   :  { %337 = shalt.err (!%p334_p2)
}
   0x9   :  { %s338_s27 = scalar_lea.vmem %s19_s19, 256  ;;  %p343_p4 = scmp.lt.s32.totalorder %s19_s19, %s19_s19 }
   0xa   :  { %p339_p3 = scmp.ne.s32.totalorder %s19_s19, %s338_s27  ;;  %p344_p5 = scmp.lt.s32.totalorder %s338_s27, %s338_s27 }
   0xc   :  { %p345_p6 = por %p344_p5, %p343_p4 }
   0xe   :  { %p346_p7 = pnand %p345_p6, %p339_p3 }
  0x10   :  { %349 = shalt.err (!%p346_p7)
}
  0x11   :  { %s401_s28 = smov 128   ;;  %s402_s29 = smov 8  }
  0x12   :  { %24 = dma.hbm_to_vmem [thread:$0]  %s509_s0, 256, %s19_s19, [#allocation3], %s401_s28, %s401_s28, %s402_s29  }
  0x13   :  { %s403_s7 = smov [#allocation5]   ;;  %s350_s11 = scalar_lea.hbm %s512_s3, 2048 }
  0x14   :  { %s34_s8 = sshll.u32 %s403_s7, 4  ;;  %p351_p8 = scmp.ne.s32.totalorder %s512_s3, %s350_s11  ;;  %s35_s8 = int_to_ptr.vmem [resolvable:$true] %s34_s8 }
  0x15   :  { %p354_p9 = scmp.lt.u32.totalorder %s350_s11, %s512_s3 }
  0x17   :  { %p356_p10 = pnand %p354_p9, %p351_p8 }
  0x19   :  { %359 = shalt.err (!%p356_p10)
}
  0x1a   :  { %s360_s16 = scalar_lea.vmem %s35_s8, 2048  ;;  %p365_p12 = scmp.lt.s32.totalorder %s35_s8, %s35_s8 }
  0x1b   :  { %p361_p11 = scmp.ne.s32.totalorder %s35_s8, %s360_s16  ;;  %p366_p13 = scmp.lt.s32.totalorder %s360_s16, %s360_s16 }
  0x1d   :  { %p367_p0 = por %p366_p13, %p365_p12 }
  0x1f   :  { %p368_p1 = pnand %p367_p0, %p361_p11 }
  0x21   :  { %371 = shalt.err (!%p368_p1)
}
  0x22   :  { %40 = dma.hbm_to_vmem [thread:$0]  %s512_s3, 2048, %s35_s8, [#allocation6], %s401_s28, %s401_s28, %s402_s29  }
  0x23   :  { %394 = dma.done.wait [#allocation3], 256  }
  0x24   :  { %395 = vsyncadd [#allocation3], 4294967040 }
  0x25   :  { %396 = dma.done.wait [#allocation6], 2048  }
  0x26   :  { %397 = vsyncadd [#allocation6], 4294965248  ;;  %v465_v0 = vld [vmem:[#allocation2] sm:$0xff]  ;;  %v468_v1 = vld [vmem:[#allocation2 + $0x8] sm:$0xff] }
  0x27   :  { %51 = vadd.xlane.f32.xlu0 %v465_v0  ;;  %v107_v10 = vld [vmem:[#allocation5] sm:$0xff]  ;;  %v108_v11 = vld [vmem:[#allocation5 + $0x8] sm:$0xff]  ;;  %v109_v13 = vld [vmem:[#allocation5 + $0x10] sm:$0xff] }
  0x28   :  { %v283_v12 = vpack.c.bf16 %v108_v11, %v107_v10  ;;  %v110_v14 = vld [vmem:[#allocation5 + $0x18] sm:$0xff]  ;;  %v111_v16 = vld [vmem:[#allocation5 + $0x20] sm:$0xff]  ;;  %v112_v17 = vld [vmem:[#allocation5 + $0x28] sm:$0xff] }
  0x29   :  { %v287_v15 = vpack.c.bf16 %v110_v14, %v109_v13  ;;  %v291_v18 = vpack.c.bf16 %v112_v17, %v111_v16  ;;  %v113_v19 = vld [vmem:[#allocation5 + $0x30] sm:$0xff]  ;;  %v114_v20 = vld [vmem:[#allocation5 + $0x38] sm:$0xff]  ;;  %v115_v22 = vld [vmem:[#allocation5 + $0x40] sm:$0xff] }
  0x2a   :  { %284 = vmatprep.subr.bf16.mxu0 %v283_v12  ;;  %v295_v21 = vpack.c.bf16 %v114_v20, %v113_v19  ;;  %v116_v23 = vld [vmem:[#allocation5 + $0x48] sm:$0xff]  ;;  %v117_v24 = vld [vmem:[#allocation5 + $0x50] sm:$0xff]  ;;  %v118_v26 = vld [vmem:[#allocation5 + $0x58] sm:$0xff] }
  0x2b   :  { %53 = vadd.xlane.f32.xlu0 %v468_v1  ;;  %286 = vmatpush3.bf16.msra.mxu0 %v283_v12  ;;  %v299_v25 = vpack.c.bf16 %v116_v23, %v115_v22  ;;  %v303_v27 = vpack.c.bf16 %v118_v26, %v117_v24  ;;  %v119_v28 = vld [vmem:[#allocation5 + $0x60] sm:$0xff]  ;;  %v120_v29 = vld [vmem:[#allocation5 + $0x68] sm:$0xff]  ;;  %v121_v31 = vld [vmem:[#allocation5 + $0x70] sm:$0xff] }
  0x2c   :  { %288 = vmatprep.subr.bf16.mxu0 %v287_v15  ;;  %v307_v30 = vpack.c.bf16 %v120_v29, %v119_v28  ;;  %v122_v32 = vld [vmem:[#allocation5 + $0x78] sm:$0xff]  ;;  %v227_v50 = vld [vmem:[%s510_s1] ss:$0 sm:$0xff]  ;;  %s404_s1 = smov [#allocation7]  }
  0x2d   :  { %v311_v33 = vpack.c.bf16 %v122_v32, %v121_v31  ;;  %v228_v53 = vld [vmem:[%s511_s2] ss:$0 sm:$0xff]  ;;  %s214_s23 = sshll.u32 %s404_s1, 4  ;;  %s215_s23 = int_to_ptr.vmem [resolvable:$true] %s214_s23 }
  0x2e   :  { %v229_v60 = vld [vmem:[%s513_s4] ss:$0 sm:$0xff]  ;;  %s372_s2 = scalar_lea.vmem %s215_s23, 256  ;;  %p377_p3 = scmp.lt.s32.totalorder %s215_s23, %s215_s23 }
  0x2f   :  { %290 = vmatpush3.bf16.msra.mxu0 %v287_v15  ;;  %p373_p2 = scmp.ne.s32.totalorder %s215_s23, %s372_s2  ;;  %p378_p4 = scmp.lt.s32.totalorder %s372_s2, %s372_s2 }
  0x30   :  { %292 = vmatprep.subr.bf16.mxu0 %v291_v18 }
  0x31   :  { %p379_p5 = por %p378_p4, %p377_p3 }
  0x33   :  { %294 = vmatpush3.bf16.msra.mxu0 %v291_v18  ;;  %p380_p6 = pnand %p379_p5, %p373_p2 }
  0x34   :  { %296 = vmatprep.subr.bf16.mxu0 %v295_v21 }
  0x37   :  { %298 = vmatpush3.bf16.msra.mxu0 %v295_v21 }
  0x38   :  { %300 = vmatprep.subr.bf16.mxu0 %v299_v25 }
  0x3b   :  { %302 = vmatpush3.bf16.msra.mxu0 %v299_v25 }
  0x3c   :  { %304 = vmatprep.subr.bf16.mxu0 %v303_v27 }
  0x3f   :  { %306 = vmatpush3.bf16.msra.mxu0 %v303_v27 }
  0x40   :  { %308 = vmatprep.subr.bf16.mxu0 %v307_v30 }
  0x43   :  { %310 = vmatpush3.bf16.msra.mxu0 %v307_v30 }
  0x44   :  { %312 = vmatprep.subr.bf16.mxu0 %v311_v33 }
  0x47   :  { %314 = vmatpush3.bf16.msra.mxu0 %v311_v33 }
  0xb4   :  { %v52_v2 = vpop.xlane.xlu0 %51 }
  0xb5   :  { %v56_v3 = vmul.f32 0.0078125, %v52_v2 }
  0xb7   :  { %v472_v4 = vsub.f32 %v465_v0, %v56_v3 }
  0xb8   :  { %v54_v5 = vpop.xlane.xlu0 %53 }
  0xb9   :  { %v57_v6 = vmul.f32 0.0078125, %v54_v5  ;;  %v60_v7 = vmul.f32 %v472_v4, %v472_v4  ;;  %v95_v51 = vmul.f32 %v227_v50, %v472_v4 }
  0xbb   :  { %v477_v8 = vsub.f32 %v468_v1, %v57_v6  ;;  %62 = vadd.xlane.f32.xlu1 %v60_v7 }
  0xbd   :  { %v61_v9 = vmul.f32 %v477_v8, %v477_v8  ;;  %v96_v55 = vmul.f32 %v227_v50, %v477_v8 }
  0xbf   :  { %64 = vadd.xlane.f32.xlu1 %v61_v9 }
 0x148   :  { %v63_v34 = vpop.xlane.xlu1 %62 }
 0x149   :  { %v67_v35 = vmul.f32 0.007874016, %v63_v34 }
 0x14b   :  { %320 = vrsqrt.f32 %v67_v35  ;;  %vm71_vm0 = vcmp.eq.f32.partialorder %v67_v35, inf  ;;  %v74_v40 = vand.u32 2147483648, %v67_v35  ;;  %vm73_vm1 = vcmp.eq.f32.partialorder %v67_v35, 0.0 }
 0x14c   :  { %v65_v36 = vpop.xlane.xlu1 %64 }
 0x14d   :  { %v68_v37 = vmul.f32 0.007874016, %v65_v36 }
 0x14f   :  { %322 = vrsqrt.f32 %v68_v37  ;;  %vm78_vm2 = vcmp.eq.f32.partialorder %v68_v37, inf  ;;  %v81_v46 = vand.u32 2147483648, %v68_v37  ;;  %vm80_vm3 = vcmp.eq.f32.partialorder %v68_v37, 0.0 }
 0x155   :  { %v321_v38 = vpop.eup %320 }
 0x156   :  { %v70_v39 = vmul.f32 %v321_v38, %v67_v35 }
 0x158   :  { %v72_v41 = vsel %vm71_vm0, %v67_v35, %v70_v39 }
 0x159   :  { %v323_v42 = vpop.eup %322  ;;  %v75_v43 = vsel %vm73_vm1, %v74_v40, %v72_v41 }
 0x15a   :  { %v77_v44 = vmul.f32 %v323_v42, %v68_v37  ;;  %v83_v45 = vadd.f32 1e-06, %v75_v43 }
 0x15c   :  { %v79_v47 = vsel %vm78_vm2, %v68_v37, %v77_v44  ;;  %324 = vrcp.f32 %v83_v45 }
 0x15d   :  { %v82_v48 = vsel %vm80_vm3, %v81_v46, %v79_v47 }
 0x15e   :  { %v84_v49 = vadd.f32 1e-06, %v82_v48 }
 0x160   :  { %326 = vrcp.f32 %v84_v49 }
 0x166   :  { %v325_v52 = vpop.eup %324 }
 0x167   :  { %v97_v54 = vmul.f32 %v325_v52, %v95_v51 }
 0x169   :  { %v105_v56 = vadd.f32 %v228_v53, %v97_v54 }
 0x16a   :  { %v327_v57 = vpop.eup %326 }
 0x16b   :  { %v98_v58 = vmul.f32 %v327_v57, %v96_v55  ;;  %280 = vmatprep.mubr.f32.mxu0 %v105_v56 }
 0x16d   :  { %v106_v59 = vadd.f32 %v228_v53, %v98_v58 }
 0x16f   :  { %281 = vmatmul.mubr.f32.vlgmr.msra.gmra.mrb[0].mxu0 %v106_v59 }
 0x242   :  { %v282_v61 = vpop.f32.mrb[0].mxu0 }
 0x243   :  { %v202_v62 = vadd.f32 %v282_v61, %v229_v60  ;;  %v196_v63 = vpop.f32.mrb[1].mxu0 }
 0x244   :  { %v197_v2 = vadd.f32 %v229_v60, %v196_v63 }
 0x245   :  { %v206_v3 = vadd.f32 %v202_v62, %v468_v1 }
 0x246   :  { %v205_v4 = vadd.f32 %v197_v2, %v465_v0 }
 0x247   :  { %208 = vst [vmem:[#allocation7 + $0x8] sm:$0xff] %v206_v3 }
 0x248   :  { %207 = vst [vmem:[#allocation7] sm:$0xff] %v205_v4 }
 0x249   :  { %383 = shalt.err (!%p380_p6)
}
 0x24a   :  { %s384_s25 = scalar_lea.hbm %s514_s5, 256 }
 0x24b   :  { %p385_p7 = scmp.ne.s32.totalorder %s514_s5, %s384_s25  ;;  %p388_p8 = scmp.lt.u32.totalorder %s384_s25, %s514_s5 }
 0x24d   :  { %p390_p9 = pnand %p388_p8, %p385_p7 }
 0x24f   :  { %393 = shalt.err (!%p390_p9)
}
 0x250   :  { %220 = dma.vmem_to_hbm [thread:$0]  %s215_s23, 256, %s514_s5, [#allocation4], %s401_s28, %s401_s28, %s402_s29  }
 0x251   :  { %398 = dma.done.wait [#allocation4], 256  }
 0x252   :  { %399 = vsyncadd [#allocation4], 4294967040 }
 0x253   :  { %224 = vsyncpa [#allocation3], 1 }
 0x254   :  { %225 = vsyncpa [#allocation6], 1 }
 0x255   :  { %226 = vsyncpa [#allocation4], 1 }

</bundles_post_ra>
